<compile_context>
chip_gen: v7x
topology: tpu7x:2x2x1
jax: 0.10.0
libtpu: 0.0.40
codegen_flags: <defaults>
</compile_context>

<pallas_src>
import jax
import jax.numpy as jnp
from jax.experimental import pallas as pl
from jax.experimental.pallas import tpu as pltpu

_LANES = 128                 # vreg lane width (last dim)
_SMALL_ROWS = 1024           # <= this many 128-lane rows -> single un-gridded call
_MAX_BLOCK_ROWS = 8192       # (8192, 128) f32 tile = 4 MiB; 16 MiB live double-buffered
_TARGET_GRID_STEPS = 4       # aim for >= 4 pipelined steps on mid-size inputs


def _sublane_multiple(dtype) -> int:
    """Rows per packed vreg: f32 -> 8, bf16 -> 16, int8/fp8 -> 32."""
    itemsize = jnp.dtype(dtype).itemsize
    return 8 * max(1, 4 // itemsize)


def _sigmoid_kernel(x_ref, o_ref):
    # Elementwise sigmoid on the whole VMEM tile (exp on EUP, rest on VPU).
    o_ref[...] = jax.nn.sigmoid(x_ref[...])


def mynn_forward(x: jax.Array) -> jax.Array:
    """sigmoid(x) computed in a Pallas TPU kernel (any shape, float dtype)."""
    orig_shape = x.shape
    dtype = x.dtype

    # Lane-dense layout: flatten and (only if needed) pad to a multiple of 128.
    flat = x.reshape(-1)
    n = flat.shape[0]
    padded_n = pl.cdiv(n, _LANES) * _LANES
    if padded_n != n:
        flat = jnp.pad(flat, (0, padded_n - n))
    rows = padded_n // _LANES
    x2d = flat.reshape(rows, _LANES)          # last dim = 128 -> unmasked stores

    if rows <= _SMALL_ROWS:
        # Small case: one whole-array VMEM block, no grid machinery.
        out2d = pl.pallas_call(
            _sigmoid_kernel,
            out_shape=jax.ShapeDtypeStruct((rows, _LANES), dtype),
            in_specs=[pl.BlockSpec(memory_space=pltpu.MemorySpace.VMEM)],
            out_specs=pl.BlockSpec(memory_space=pltpu.MemorySpace.VMEM),
            input_output_aliases={0: 0},
        )(x2d)
    else:
        # Large case: 1-D grid over row-blocks, auto double-buffered.
        sub = _sublane_multiple(dtype)
        block_rows = min(
            _MAX_BLOCK_ROWS,
            pl.cdiv(pl.cdiv(rows, _TARGET_GRID_STEPS), sub) * sub,
        )
        grid = (pl.cdiv(rows, block_rows),)   # ragged last block is masked by Pallas
        out2d = pl.pallas_call(
            _sigmoid_kernel,
            out_shape=jax.ShapeDtypeStruct((rows, _LANES), dtype),
            grid=grid,
            in_specs=[pl.BlockSpec((block_rows, _LANES), lambda i: (i, 0))],
            out_specs=pl.BlockSpec((block_rows, _LANES), lambda i: (i, 0)),
            input_output_aliases={0: 0},
            compiler_params=pltpu.CompilerParams(
                dimension_semantics=("parallel",),   # 2-TC split on v7x
                vmem_limit_bytes=48 << 20,           # headroom for 4 MiB tiles on v5e
            ),
        )(x2d)

    out = out2d.reshape(-1)
    if padded_n != n:
        out = out[:n]
    return out.reshape(orig_shape)


if __name__ == "__main__":
    key = jax.random.PRNGKey(0)
    # NCHW activation tensor consistent with the PyTorch module's usage.
    x = jax.random.normal(key, (2, 4, 16, 16), dtype=jnp.float32)

    y = mynn_forward(x)
    jax.block_until_ready(y)

    # Correctness check against the pure-JAX reference.
    ref = jax.nn.sigmoid(x)
    assert y.shape == x.shape and y.dtype == x.dtype
    assert jnp.allclose(y, ref, atol=1e-6, rtol=1e-6)

    print("KERNEL_OK")
</pallas_src>

<mosaic_0001>
module attributes {stable_mosaic.version = 11 : i64} {
  func.func @_sigmoid_kernel(%arg0: memref<16x128xf32, #tpu.memory_space<vmem>>, %arg1: memref<16x128xf32, #tpu.memory_space<vmem>>) attributes {dimension_semantics = [], scalar_prefetch = 0 : i64, scratch_operands = 0 : i64, tpu.core_type = #tpu.core_type<tc>} {
    %c0 = arith.constant 0 : index
    %c0_0 = arith.constant 0 : index
    %0 = vector.load %arg0[%c0, %c0_0] : memref<16x128xf32, #tpu.memory_space<vmem>>, vector<16x128xf32>
    %1 = arith.negf %0 : vector<16x128xf32>
    %2 = math.exp %1 : vector<16x128xf32>
    %cst = arith.constant 1.000000e+00 : f32
    %3 = vector.broadcast %cst : f32 to vector<16x128xf32>
    %4 = arith.addf %3, %2 : vector<16x128xf32>
    %5 = arith.divf %3, %4 : vector<16x128xf32>
    %c0_1 = arith.constant 0 : index
    %c0_2 = arith.constant 0 : index
    %6 = vector.load %arg1[%c0_1, %c0_2] : memref<16x128xf32, #tpu.memory_space<vmem>>, vector<16x128xf32>
    tpu.vector_store %arg1[%c0_1, %c0_2], %5 {strides = array<i32>} : memref<16x128xf32, #tpu.memory_space<vmem>>, vector<16x128xf32>,
    return
  }
}

</mosaic_0001>

<bundles_post_ra>
// kernel: tpu_custom_call.1
= control target key start
LH: loop header
LB: loop body
LE: loop exit
PB: predicated region body
PF: predicated region fallthrough
CT: control target
= control target key end

     0   :  { %6 = vsyncpa [#allocation3], 0  ;;  %s162_s0 = inlined_call_operand.hbm [shape: f32[16,128], index: 0, kind: input, shape index: {}, may-alias: {0,1}]   ;;  %s163_s1 = inlined_call_operand.hbm [shape: f32[16,128], index: 1, kind: output, shape index: {}, may-alias: {0,1}]  }
   0x1   :  { %7 = vsyncpa [#allocation4], 0  ;;  %s118_s6 = smov [#allocation2]   ;;  %s70_s10 = scalar_lea.hbm %s162_s0, 256 }
   0x2   :  { %s13_s7 = sshll.u32 %s118_s6, 4  ;;  %p71_p0 = scmp.ne.s32.totalorder %s162_s0, %s70_s10  ;;  %s14_s7 = int_to_ptr.vmem [resolvable:$true] %s13_s7 }
   0x3   :  { %p74_p1 = scmp.lt.u32.totalorder %s70_s10, %s162_s0 }
   0x5   :  { %p76_p2 = pnand %p74_p1, %p71_p0 }
   0x7   :  { %79 = shalt.err (!%p76_p2)
}
   0x8   :  { %s80_s15 = scalar_lea.vmem %s14_s7, 256  ;;  %p85_p4 = scmp.lt.s32.totalorder %s14_s7, %s14_s7 }
   0x9   :  { %p81_p3 = scmp.ne.s32.totalorder %s14_s7, %s80_s15  ;;  %p86_p5 = scmp.lt.s32.totalorder %s80_s15, %s80_s15 }
   0xb   :  { %p87_p6 = por %p86_p5, %p85_p4 }
   0xd   :  { %p88_p7 = pnand %p87_p6, %p81_p3 }
   0xf   :  { %91 = shalt.err (!%p88_p7)
}
  0x10   :  { %s119_s16 = smov 128   ;;  %s120_s17 = smov 8  }
  0x11   :  { %19 = dma.hbm_to_vmem [thread:$0]  %s162_s0, 256, %s14_s7, [#allocation3], %s119_s16, %s119_s16, %s120_s17  }
  0x12   :  { %114 = dma.done.wait [#allocation3], 256  }
  0x13   :  { %115 = vsyncadd [#allocation3], 4294967040  ;;  %v23_v0 = vld [vmem:[#allocation2] sm:$0xff]  ;;  %v24_v1 = vld [vmem:[#allocation2 + $0x8] sm:$0xff]  ;;  %s121_s20 = smov [#allocation5]  }
  0x14   :  { %v56_v2 = vmul.f32 -1.442695, %v23_v0  ;;  %v57_v3 = vmul.f32 -1.442695, %v24_v1  ;;  %s44_s21 = sshll.u32 %s121_s20, 4  ;;  %s45_s21 = int_to_ptr.vmem [resolvable:$true] %s44_s21 }
  0x15   :  { %s92_s0 = scalar_lea.vmem %s45_s21, 256  ;;  %p97_p9 = scmp.lt.s32.totalorder %s45_s21, %s45_s21 }
  0x16   :  { %62 = vpow2.f32 %v56_v2  ;;  %p93_p8 = scmp.ne.s32.totalorder %s45_s21, %s92_s0  ;;  %p98_p10 = scmp.lt.s32.totalorder %s92_s0, %s92_s0 }
  0x17   :  { %64 = vpow2.f32 %v57_v3 }
  0x18   :  { %p99_p11 = por %p98_p10, %p97_p9 }
  0x1a   :  { %p100_p12 = pnand %p99_p11, %p93_p8 }
  0x20   :  { %v63_v4 = vpop.eup %62 }
  0x21   :  { %v65_v5 = vpop.eup %64  ;;  %v31_v6 = vadd.f32 1.0, %v63_v4 }
  0x22   :  { %v32_v7 = vadd.f32 1.0, %v65_v5 }
  0x23   :  { %66 = vrcp.f32 %v31_v6 }
  0x24   :  { %68 = vrcp.f32 %v32_v7 }
  0x2d   :  { %v67_v8 = vpop.eup %66 }
  0x2e   :  { %v69_v9 = vpop.eup %68  ;;  %37 = vst [vmem:[#allocation5] sm:$0xff] %v67_v8 }
  0x2f   :  { %38 = vst [vmem:[#allocation5 + $0x8] sm:$0xff] %v69_v9 }
  0x30   :  { %103 = shalt.err (!%p100_p12)
}
  0x31   :  { %s104_s24 = scalar_lea.hbm %s163_s1, 256 }
  0x32   :  { %p105_p13 = scmp.ne.s32.totalorder %s163_s1, %s104_s24  ;;  %p108_p0 = scmp.lt.u32.totalorder %s104_s24, %s163_s1 }
  0x34   :  { %p110_p1 = pnand %p108_p0, %p105_p13 }
  0x36   :  { %113 = shalt.err (!%p110_p1)
}
  0x37   :  { %50 = dma.vmem_to_hbm [thread:$0]  %s45_s21, 256, %s163_s1, [#allocation4], %s119_s16, %s119_s16, %s120_s17  }
  0x38   :  { %116 = dma.done.wait [#allocation4], 256  }
  0x39   :  { %117 = vsyncadd [#allocation4], 4294967040 }
  0x3a   :  { %54 = vsyncpa [#allocation3], 1 }
  0x3b   :  { %55 = vsyncpa [#allocation4], 1 }

</bundles_post_ra>
